<compile_context>
chip_gen: v5e
topology: v5e:2x2
jax: 0.10.0
libtpu: 0.0.40
codegen_flags: <defaults>
</compile_context>

<pallas_src>
import functools

import jax
import jax.numpy as jnp
from jax import lax
from jax.experimental import pallas as pl
from jax.experimental.pallas import tpu as pltpu


def _round_up(a, m):
    return ((a + m - 1) // m) * m


def _lnp_kernel(x_ref, w_ref, b_ref, out_ref, acc_ref, *, d_total, tk, mask_k):
    # x_ref:   (TB, TK) VMEM  -- batch tile, features on lanes (native dtype)
    # w_ref:   (1, TK)  VMEM  -- lane-major weight row slice
    # b_ref:   (1, 1)   SMEM  -- scalar bias (f32)
    # out_ref: (1, TB)  VMEM  -- batch on the lane axis (lane-dense stores)
    # acc_ref: (1, TB)  VMEM  -- f32 accumulator across the K grid axis
    k = pl.program_id(1)

    @pl.when(k == 0)
    def _():
        acc_ref[...] = jnp.zeros_like(acc_ref)

    x = x_ref[...]
    w = w_ref[...]
    if mask_k:
        # Ragged last K block: zero OOB feature lanes (select, so NaN/Inf
        # garbage in the clipped region cannot poison the accumulation).
        col = k * tk + lax.broadcasted_iota(jnp.int32, (1, tk), 1)
        valid = col < d_total
        x = jnp.where(valid, x, 0)
        w = jnp.where(valid, w, 0)

    # GEMV as w @ x^T (contract the feature axis of both operands) so the batch
    # axis lands on the output's lane axis -> lane-dense stores, no relayout of
    # the large x tile.
    acc_ref[...] += lax.dot_general(
        w, x,
        dimension_numbers=(((1,), (1,)), ((), ())),
        preferred_element_type=jnp.float32,
        precision=lax.Precision.HIGHEST,
    )

    @pl.when(k == pl.num_programs(1) - 1)
    def _():
        z = acc_ref[...] + b_ref[0, 0]
        out_ref[...] = jnp.exp(z).astype(out_ref.dtype)


def lnp_forward(x, weight, bias, *, block_rows=None, block_cols=None,
                interpret=False):
    """Pallas equivalent of: exp(x @ weight.T + bias), weight shape (1, D).

    Args:
      x:      (B, D) float array (streamed in its native floating dtype).
      weight: (1, D) float (PyTorch nn.Linear(input_dim, 1) weight layout).
      bias:   (1,)   float.
    Returns:
      (B, 1) array in x's dtype: the firing rate.
    """
    B, D = x.shape
    if (not jnp.issubdtype(x.dtype, jnp.floating)) or x.dtype == jnp.float64:
        x = x.astype(jnp.float32)
    w = jnp.asarray(weight).reshape(1, D).astype(x.dtype)
    b = jnp.asarray(bias, jnp.float32).reshape(1, 1)
    itemsize = int(jnp.dtype(x.dtype).itemsize)

    # --- per-generation VMEM budget ----------------------------------------
    try:
        vmem_cap = int(pltpu.get_tpu_info().vmem_capacity_bytes)
    except Exception:
        vmem_cap = 64 * 1024 * 1024  # v7x-safe fallback
    # v7x (64 MiB physical) -> 48 MiB limit; v5e/v6e (128 MiB) -> 96 MiB.
    vmem_limit = max(32 * 1024 * 1024,
                     min((vmem_cap * 3) // 4, 96 * 1024 * 1024))
    # Reserve room for the resident weight row, the (1,TB) output/acc buffers
    # and compiler scratch; the rest goes to the double-buffered x stream.
    reserve = 8 * 1024 * 1024
    x_budget = max(2 * 1024 * 1024, vmem_limit - reserve)
    per_buf_target = min(16 * 1024 * 1024, x_budget // 2)

    # --- tile selection (honest lane-padded accounting) ---------------------
    d_pad = _round_up(D, 128)            # f32/bf16 lanes pad to 128 in VMEM
    row_bytes = d_pad * itemsize

    if block_cols is not None:
        tk = int(block_cols)
        assert tk == D or tk % 128 == 0, "block_cols must be D or a multiple of 128"
    elif 128 * row_bytes <= per_buf_target:
        tk = D                            # whole feature axis in one block
    else:
        # Very large D: K-tile so TB can stay large without blowing VMEM
        # (matters most on v7x's 64 MiB).
        tk = max(128, (per_buf_target // (256 * itemsize)) // 128 * 128)

    if block_rows is not None:
        tb = int(block_rows)
        assert tb % 128 == 0, "block_rows must be a multiple of 128"
    else:
        tk_pad = tk if tk % 128 == 0 else _round_up(tk, 128)
        tb = max(128, (per_buf_target // (tk_pad * itemsize)) // 128 * 128)
    tb = min(tb, _round_up(B, 128))       # never tile past the (padded) batch

    nk = pl.cdiv(D, tk)
    nb = pl.cdiv(B, tb)
    mask_k = (D % tk) != 0                # ragged feature tail -> mask in-kernel
    grid = (nb, nk)

    kernel = functools.partial(_lnp_kernel, d_total=D, tk=tk, mask_k=mask_k)

    out_flat = pl.pallas_call(
        kernel,
        out_shape=jax.ShapeDtypeStruct((1, B), x.dtype),
        grid=grid,
        in_specs=[
            pl.BlockSpec((tb, tk), lambda i, k: (i, k)),            # x tile
            pl.BlockSpec((1, tk), lambda i, k: (0, k)),             # weight row
            pl.BlockSpec(memory_space=pltpu.MemorySpace.SMEM),      # bias scalar
        ],
        out_specs=pl.BlockSpec((1, tb), lambda i, k: (0, i)),       # lane-dense
        scratch_shapes=[pltpu.VMEM((1, tb), jnp.float32)],          # f32 acc
        compiler_params=pltpu.CompilerParams(
            dimension_semantics=("parallel", "arbitrary"),
            vmem_limit_bytes=vmem_limit,
        ),
        cost_estimate=pl.CostEstimate(
            flops=2 * B * D,
            transcendentals=B,
            bytes_accessed=itemsize * (B * D + D) + 4 * (B + 1),
        ),
        interpret=interpret,
    )(x, w, b)

    # (1, B) lane-major -> (B, 1); same element order, trivial reshape.
    return out_flat.reshape(B, 1)


if __name__ == "__main__":
    key = jax.random.PRNGKey(0)
    B, D = 8, 32
    kx, kw, kb = jax.random.split(key, 3)

    x = jax.random.normal(kx, (B, D), dtype=jnp.float32)
    # Deterministic init mimicking nn.Linear(D, 1): uniform(-1/sqrt(D), 1/sqrt(D)).
    bound = 1.0 / (D ** 0.5)
    weight = jax.random.uniform(kw, (1, D), minval=-bound, maxval=bound,
                                dtype=jnp.float32)
    bias = jax.random.uniform(kb, (1,), minval=-bound, maxval=bound,
                              dtype=jnp.float32)

    def ref_fn(xx, ww, bb):
        z = jnp.dot(xx, ww.T, precision=lax.Precision.HIGHEST) + bb
        return jnp.exp(z)

    # Check 1: tiny demo batch (single partial block, tb > B).
    out = jax.block_until_ready(lnp_forward(x, weight, bias))
    assert out.shape == (B, 1)
    assert jnp.allclose(out, ref_fn(x, weight, bias), rtol=1e-4, atol=1e-5)

    # Check 2: ragged batch across a multi-step batch grid (no padding copy).
    B2 = 300
    x2 = jax.random.normal(jax.random.PRNGKey(1), (B2, D), dtype=jnp.float32)
    out2 = jax.block_until_ready(lnp_forward(x2, weight, bias, block_rows=128))
    assert out2.shape == (B2, 1)
    assert jnp.allclose(out2, ref_fn(x2, weight, bias), rtol=1e-4, atol=1e-5)

    # Check 3: forced K-tiling with a ragged feature tail (accumulator +
    # init/finalize + lane masking path used for very large D).
    D3 = 200
    x3 = jax.random.normal(jax.random.PRNGKey(2), (B2, D3), dtype=jnp.float32)
    w3 = jax.random.uniform(jax.random.PRNGKey(3), (1, D3), minval=-bound,
                            maxval=bound, dtype=jnp.float32)
    out3 = jax.block_until_ready(
        lnp_forward(x3, w3, bias, block_rows=128, block_cols=128))
    assert out3.shape == (B2, 1)
    assert jnp.allclose(out3, ref_fn(x3, w3, bias), rtol=1e-4, atol=1e-5)

    print("KERNEL_OK")
</pallas_src>

<mosaic_0001>
module attributes {stable_mosaic.version = 11 : i64} {
  func.func @_lnp_kernel(%arg0: i32, %arg1: i32, %arg2: memref<128x32xf32, #tpu.memory_space<vmem>>, %arg3: memref<1x32xf32, #tpu.memory_space<vmem>>, %arg4: memref<1x1xf32, #tpu.memory_space<smem>>, %arg5: memref<1x128xf32, #tpu.memory_space<vmem>>, %arg6: memref<1x128xf32, #tpu.memory_space<vmem>>) attributes {dimension_semantics = [#tpu.dimension_semantics<parallel>, #tpu.dimension_semantics<arbitrary>], iteration_bounds = array<i64: 1, 1>, scalar_prefetch = 0 : i64, scratch_operands = 1 : i64, tpu.core_type = #tpu.core_type<tc>, window_params = [{transform_indices = @transform_0, window_bounds = array<i64: 128, 32>}, {transform_indices = @transform_1, window_bounds = array<i64: 1, 32>}, {transform_indices = @transform_2, window_bounds = array<i64: 1, 1>}, {transform_indices = @transform_3, window_bounds = array<i64: 1, 128>}]} {
    %c0_i32 = arith.constant 0 : i32
    %0 = arith.cmpi eq, %arg1, %c0_i32 : i32
    %1 = arith.extui %0 : i1 to i32
    %c0_i32_0 = arith.constant 0 : i32
    %2 = arith.cmpi ne, %1, %c0_i32_0 : i32
    scf.if %2 {
      %cst_10 = arith.constant 0.000000e+00 : f32
      %12 = vector.broadcast %cst_10 : f32 to vector<1x128xf32>
      %c0_11 = arith.constant 0 : index
      %c0_12 = arith.constant 0 : index
      %13 = vector.load %arg6[%c0_11, %c0_12] : memref<1x128xf32, #tpu.memory_space<vmem>>, vector<1x128xf32>
      tpu.vector_store %arg6[%c0_11, %c0_12], %12 {strides = array<i32>} : memref<1x128xf32, #tpu.memory_space<vmem>>, vector<1x128xf32>,
    } else {
    }
    %c0 = arith.constant 0 : index
    %c0_1 = arith.constant 0 : index
    %3 = vector.load %arg2[%c0, %c0_1] : memref<128x32xf32, #tpu.memory_space<vmem>>, vector<128x32xf32>
    %c0_2 = arith.constant 0 : index
    %c0_3 = arith.constant 0 : index
    %4 = vector.load %arg3[%c0_2, %c0_3] : memref<1x32xf32, #tpu.memory_space<vmem>>, vector<1x32xf32>
    %c0_4 = arith.constant 0 : index
    %c0_5 = arith.constant 0 : index
    %5 = vector.load %arg6[%c0_4, %c0_5] : memref<1x128xf32, #tpu.memory_space<vmem>>, vector<1x128xf32>
    %cst = arith.constant dense<0.000000e+00> : vector<1x128xf32>
    %6 = tpu.matmul %4, %3, %cst {dimension_numbers = #tpu.dot_dimension_numbers<[1], [1], [0], [0], [0, 0, 1, 0], [], []>, precision = #tpu.contract_precision<fp32>} : vector<1x32xf32>, vector<128x32xf32>, vector<1x128xf32> -> vector<1x128xf32>
    %7 = arith.addf %5, %6 : vector<1x128xf32>
    %c0_6 = arith.constant 0 : index
    %c0_7 = arith.constant 0 : index
    %8 = vector.load %arg6[%c0_6, %c0_7] : memref<1x128xf32, #tpu.memory_space<vmem>>, vector<1x128xf32>
    tpu.vector_store %arg6[%c0_6, %c0_7], %7 {strides = array<i32>} : memref<1x128xf32, #tpu.memory_space<vmem>>, vector<1x128xf32>,
    %c0_i32_8 = arith.constant 0 : i32
    %9 = arith.cmpi eq, %arg1, %c0_i32_8 : i32
    %10 = arith.extui %9 : i1 to i32
    %c0_i32_9 = arith.constant 0 : i32
    %11 = arith.cmpi ne, %10, %c0_i32_9 : i32
    scf.if %11 {
      %c0_10 = arith.constant 0 : index
      %c0_11 = arith.constant 0 : index
      %12 = vector.load %arg6[%c0_10, %c0_11] : memref<1x128xf32, #tpu.memory_space<vmem>>, vector<1x128xf32>
      %c0_12 = arith.constant 0 : index
      %c0_13 = arith.constant 0 : index
      %13 = memref.load %arg4[%c0_12, %c0_13] : memref<1x1xf32, #tpu.memory_space<smem>>
      %14 = vector.broadcast %13 : f32 to vector<1x128xf32>
      %15 = arith.addf %12, %14 : vector<1x128xf32>
      %16 = math.exp %15 : vector<1x128xf32>
      %c0_14 = arith.constant 0 : index
      %c0_15 = arith.constant 0 : index
      %17 = vector.load %arg5[%c0_14, %c0_15] : memref<1x128xf32, #tpu.memory_space<vmem>>, vector<1x128xf32>
      tpu.vector_store %arg5[%c0_14, %c0_15], %16 {strides = array<i32>} : memref<1x128xf32, #tpu.memory_space<vmem>>, vector<1x128xf32>,
    } else {
    }
    return
  }
  func.func @transform_0(%arg0: i32, %arg1: i32) -> (i32, i32) {
    %c0_i32 = arith.constant 0 : i32
    return %arg0, %arg1 : i32, i32
  }
  func.func @transform_1(%arg0: i32, %arg1: i32) -> (i32, i32) {
    %c0_i32 = arith.constant 0 : i32
    %c0_i32_0 = arith.constant 0 : i32
    return %c0_i32, %arg1 : i32, i32
  }
  func.func @transform_2(%arg0: i32, %arg1: i32) -> (i32, i32) {
    %c0_i32 = arith.constant 0 : i32
    %c0_i32_0 = arith.constant 0 : i32
    %c0_i32_1 = arith.constant 0 : i32
    return %c0_i32, %c0_i32_0 : i32, i32
  }
  func.func @transform_3(%arg0: i32, %arg1: i32) -> (i32, i32) {
    %c0_i32 = arith.constant 0 : i32
    %c0_i32_0 = arith.constant 0 : i32
    return %c0_i32, %arg0 : i32, i32
  }
}

</mosaic_0001>

<bundles_post_ra>
// kernel: tpu_custom_call.1
= control target key start
LH: loop header
LB: loop body
LE: loop exit
PB: predicated region body
PF: predicated region fallthrough
CT: control target
= control target key end

     0   :  { %9 = vsyncpa [#allocation5], 0  ;;  %s817_s0 = inlined_call_operand.hbm [shape: f32[8,32], index: 0, kind: input, shape index: {}]   ;;  %s818_s1 = inlined_call_operand.vmem [shape: f32[1,32], index: 1, kind: input, shape index: {}]   ;;  %s819_s2 = inlined_call_operand.<no memory space> [shape: f32[1,1], index: 2, kind: input, shape index: {}]   ;;  %s820_s3 = inlined_call_operand.hbm [shape: f32[1,8], index: 3, kind: output, shape index: {}]  }
   0x1   :  { %10 = vsyncpa [#allocation6], 0 }
   0x2   :  { %14 = vsyncadd [#allocation5], 1920  ;;  %s15_s14 = sshll.u32 %s817_s0, 4  ;;  %s536_s15 = smov [#allocation4]   ;;  %s16_s14 = int_to_ptr.hbm [resolvable:$true] %s15_s14 }
   0x3   :  { %s17_s16 = sshll.u32 %s536_s15, 4  ;;  %s537_s17 = smov 128   ;;  %s18_s16 = int_to_ptr.vmem [resolvable:$true] %s17_s16 }
   0x4   :  { %s538_s18 = smov 8  }
   0x5   :  { %23 = dma.hbm_to_vmem [thread:$0]  %s16_s14, 128, %s18_s16, [#allocation5], %s537_s17, %s537_s17, %s538_s18  }
   0x6   :  { %532 = dma.done.wait [#allocation5], 2048  }
   0x7   :  { %533 = vsyncadd [#allocation5], 4294965248  ;;  %vm55_vm0 = vcmask 261120   ;;  %v52_v0 = vld [vmem:[#allocation4 + $0x78] sm:$0xff]  ;;  %v51_v1 = vld [vmem:[#allocation4 + $0x70] sm:$0xff]  ;;  %s540_s21 = smov [#allocation7]  }
   0x8   :  { %v50_v2 = vld [vmem:[#allocation4 + $0x68] sm:$0xff]  ;;  %v105_v3 = vsel %vm55_vm0, %v52_v0, 0  ;;  %v102_v4 = vsel %vm55_vm0, %v51_v1, 0  ;;  %v49_v6 = vld [vmem:[#allocation4 + $0x60] sm:$0xff]  ;;  %v48_v7 = vld [vmem:[#allocation4 + $0x58] sm:$0xff]  ;;  %s465_s22 = sshll.u32 %s540_s21, 4  ;;  %s466_s22 = int_to_ptr.vmem [resolvable:$true] %s465_s22 }
   0x9   :  { %v99_v5 = vsel %vm55_vm0, %v50_v2, 0  ;;  %v567_v8 = vand.u32 4294901760, %v105_v3  ;;  %v569_v9 = vand.u32 4294901760, %v102_v4  ;;  %v96_v11 = vsel %vm55_vm0, %v49_v6, 0  ;;  %v47_v17 = vld [vmem:[#allocation4 + $0x50] sm:$0xff]  ;;  %v46_v26 = vld [vmem:[#allocation4 + $0x48] sm:$0xff] }
   0xa   :  { %v571_v10 = vand.u32 4294901760, %v99_v5  ;;  %v574_v12 = vand.u32 4294901760, %v96_v11  ;;  %v93_v16 = vsel %vm55_vm0, %v48_v7, 0  ;;  %v90_v21 = vsel %vm55_vm0, %v47_v17, 0  ;;  %v45_v34 = vld [vmem:[#allocation4 + $0x40] sm:$0xff]  ;;  %v44_v41 = vld [vmem:[#allocation4 + $0x38] sm:$0xff] }
   0xb   :  { %108 = vmatpush.xpose.msra.mxu0 %v567_v8  ;;  %v578_v13 = vsub.f32 %v105_v3, %v567_v8  ;;  %v581_v14 = vsub.f32 %v102_v4, %v569_v9  ;;  %304 = vmatpush.xpose.msra.mxu3 %v567_v8  ;;  %v591_v20 = vand.u32 4294901760, %v93_v16  ;;  %v607_v28 = vand.u32 4294901760, %v90_v21  ;;  %v43_v48 = vld [vmem:[#allocation4 + $0x30] sm:$0xff]  ;;  %v42_v54 = vld [vmem:[#allocation4 + $0x28] sm:$0xff]  ;;  %v41_v62 = vld [vmem:[#allocation4 + $0x20] sm:$0xff]  ;;  %s467_s25 = sshll.u32 %s820_s3, 4  ;;  %s468_s25 = int_to_ptr.hbm [resolvable:$true] %s467_s25 }
   0xc   :  { %v584_v15 = vsub.f32 %v99_v5, %v571_v10  ;;  %v603_v25 = vsub.f32 %v96_v11, %v574_v12  ;;  %v87_v29 = vsel %vm55_vm0, %v46_v26, 0  ;;  %v84_v40 = vsel %vm55_vm0, %v45_v34, 0  ;;  %v40_v5 = vld [vmem:[#allocation4 + $0x18] sm:$0xff]  ;;  %v38_v34 = vld [vmem:[#allocation4 + $0x8] sm:$0xff] }
   0xd   :  { %v150_v18 = vand.u32 4294901760, %v578_v13  ;;  %v156_v19 = vand.u32 4294901760, %v581_v14  ;;  %251 = vmatpush.xpose.msra.mxu2 %v578_v13  ;;  %v616_v33 = vsub.f32 %v93_v16, %v591_v20  ;;  %v620_v35 = vand.u32 4294901760, %v87_v29 }
   0xe   :  { %v162_v24 = vand.u32 4294901760, %v584_v15  ;;  %v168_v32 = vand.u32 4294901760, %v603_v25  ;;  %v628_v39 = vsub.f32 %v90_v21, %v607_v28  ;;  %v641_v46 = vand.u32 4294901760, %v84_v40 }
   0xf   :  { %110 = vmatpush.xpose.msra.mxu0 %v569_v9  ;;  %v151_v22 = vsub.f32 %v578_v13, %v150_v18  ;;  %v157_v23 = vsub.f32 %v581_v14, %v156_v19  ;;  %306 = vmatpush.xpose.msra.mxu3 %v569_v9  ;;  %v174_v38 = vand.u32 4294901760, %v616_v33  ;;  %v634_v42 = vsub.f32 %v87_v29, %v620_v35  ;;  %v53_v13 = vld [vmem:[%s818_s1] sm:$0x1] }
  0x10   :  { %v163_v31 = vsub.f32 %v584_v15, %v162_v24  ;;  %v169_v37 = vsub.f32 %v603_v25, %v168_v32  ;;  %v180_v45 = vand.u32 4294901760, %v628_v39  ;;  %v81_v47 = vsel %vm55_vm0, %v44_v41, 0 }
  0x11   :  { %v152_v27 = vand.u32 4294901760, %v151_v22  ;;  %254 = vmatpush.xpose.msra.mxu2 %v581_v14  ;;  %v158_v30 = vand.u32 4294901760, %v157_v23  ;;  %v175_v44 = vsub.f32 %v616_v33, %v174_v38  ;;  %v186_v49 = vand.u32 4294901760, %v634_v42  ;;  %v39_v22 = vld [vmem:[#allocation4 + $0x10] sm:$0xff] }
  0x12   :  { %v164_v36 = vand.u32 4294901760, %v163_v31  ;;  %v170_v43 = vand.u32 4294901760, %v169_v37  ;;  %v181_v51 = vsub.f32 %v628_v39, %v180_v45  ;;  %v651_v52 = vand.u32 4294901760, %v81_v47 }
  0x13   :  { %153 = vmatpush.xpose.msra.mxu1 %v152_v27  ;;  %112 = vmatpush.xpose.msra.mxu0 %v571_v10  ;;  %v176_v50 = vand.u32 4294901760, %v175_v44  ;;  %v654_v53 = vsub.f32 %v84_v40, %v641_v46  ;;  %v78_v55 = vsel %vm55_vm0, %v43_v48, 0  ;;  %v187_v56 = vsub.f32 %v634_v42, %v186_v49 }
  0x14   :  { %308 = vmatpush.xpose.msra.mxu3 %v571_v10  ;;  %v75_v57 = vsel %vm55_vm0, %v42_v54, 0  ;;  %v182_v58 = vand.u32 4294901760, %v181_v51  ;;  %v665_v60 = vand.u32 4294901760, %v78_v55  ;;  %v668_v61 = vsub.f32 %v81_v47, %v651_v52  ;;  %v37_v47 = vld [vmem:[#allocation4] sm:$0xff] }
  0x15   :  { %257 = vmatpush.xpose.msra.mxu2 %v584_v15  ;;  %v192_v59 = vand.u32 4294901760, %v654_v53  ;;  %v188_v63 = vand.u32 4294901760, %v187_v56  ;;  %v672_v0 = vand.u32 4294901760, %v75_v57  ;;  %v72_v4 = vsel %vm55_vm0, %v41_v62, 0 }
  0x16   :  { %v198_v2 = vand.u32 4294901760, %v668_v61  ;;  %v680_v3 = vsub.f32 %v78_v55, %v665_v60  ;;  %v685_v6 = vand.u32 4294901760, %v72_v4  ;;  %v69_v21 = vsel %vm55_vm0, %v40_v5, 0 }
  0x17   :  { %159 = vmatpush.xpose.msra.mxu1 %v158_v30  ;;  %114 = vmatpush.xpose.msra.mxu0 %v574_v12  ;;  %v193_v1 = vsub.f32 %v654_v53, %v192_v59  ;;  %v693_v17 = vsub.f32 %v75_v57, %v672_v0  ;;  %v706_v30 = vand.u32 4294901760, %v69_v21  ;;  %v66_v31 = vsel %vm55_vm0, %v39_v22, 0 }
  0x18   :  { %310 = vmatpush.xpose.msra.mxu3 %v574_v12  ;;  %v199_v11 = vsub.f32 %v668_v61, %v198_v2  ;;  %v204_v16 = vand.u32 4294901760, %v680_v3  ;;  %v699_v23 = vsub.f32 %v72_v4, %v685_v6  ;;  %v716_v41 = vand.u32 4294901760, %v66_v31 }
  0x19   :  { %260 = vmatpush.xpose.msra.mxu2 %v603_v25  ;;  %v194_v7 = vand.u32 4294901760, %v193_v1  ;;  %v210_v29 = vand.u32 4294901760, %v693_v17  ;;  %v63_v44 = vsel %vm55_vm0, %v38_v34, 0  ;;  %v60_v56 = vsel %vm55_vm0, %v37_v47, 0 }
  0x1a   :  { %v200_v26 = vand.u32 4294901760, %v199_v11  ;;  %v205_v27 = vsub.f32 %v680_v3, %v204_v16  ;;  %v729_v54 = vand.u32 4294901760, %v63_v44  ;;  %v732_v55 = vsub.f32 %v66_v31, %v716_v41 }
  0x1b   :  { %165 = vmatpush.xpose.msra.mxu1 %v164_v36  ;;  %116 = vmatpush.xpose.msra.mxu0 %v591_v20  ;;  %v216_v36 = vand.u32 4294901760, %v699_v23  ;;  %v211_v40 = vsub.f32 %v693_v17, %v210_v29  ;;  %v57_v14 = vsel %vm55_vm0, %v53_v13, 0 }
  0x1c   :  { %312 = vmatpush.xpose.msra.mxu3 %v591_v20  ;;  %v206_v37 = vand.u32 4294901760, %v205_v27  ;;  %v228_v62 = vand.u32 4294901760, %v732_v55  ;;  %v745_v1 = vsub.f32 %v63_v44, %v729_v54 }
  0x1d   :  { %263 = vmatpush.xpose.msra.mxu2 %v616_v33  ;;  %v217_v48 = vsub.f32 %v699_v23, %v216_v36 }
  0x1e   :  { %v229_v5 = vsub.f32 %v732_v55, %v228_v62 }
  0x1f   :  { %171 = vmatpush.xpose.msra.mxu1 %v170_v43  ;;  %118 = vmatpush.xpose.msra.mxu0 %v607_v28  ;;  %v719_v43 = vsub.f32 %v69_v21, %v706_v30  ;;  %v218_v57 = vand.u32 4294901760, %v217_v48 }
  0x20   :  { %314 = vmatpush.xpose.msra.mxu3 %v607_v28  ;;  %v230_v21 = vand.u32 4294901760, %v229_v5 }
  0x21   :  { %266 = vmatpush.xpose.msra.mxu2 %v628_v39  ;;  %v222_v51 = vand.u32 4294901760, %v719_v43 }
  0x23   :  { %177 = vmatpush.xpose.msra.mxu1 %v176_v50  ;;  %120 = vmatpush.xpose.msra.mxu0 %v620_v35  ;;  %v212_v50 = vand.u32 4294901760, %v211_v40 }
  0x24   :  { %316 = vmatpush.xpose.msra.mxu3 %v620_v35 }
  0x25   :  { %269 = vmatpush.xpose.msra.mxu2 %v634_v42 }
  0x27   :  { %183 = vmatpush.xpose.msra.mxu1 %v182_v58  ;;  %122 = vmatpush.xpose.msra.mxu0 %v641_v46  ;;  %v223_v58 = vsub.f32 %v719_v43, %v222_v51 }
  0x28   :  { %318 = vmatpush.xpose.msra.mxu3 %v641_v46 }
  0x29   :  { %272 = vmatpush.xpose.msra.mxu2 %v654_v53  ;;  %v224_v4 = vand.u32 4294901760, %v223_v58 }
  0x2b   :  { %189 = vmatpush.xpose.msra.mxu1 %v188_v63  ;;  %124 = vmatpush.xpose.msra.mxu0 %v651_v52  ;;  %v742_v63 = vand.u32 4294901760, %v60_v56 }
  0x2c   :  { %320 = vmatpush.xpose.msra.mxu3 %v651_v52 }
  0x2d   :  { %275 = vmatpush.xpose.msra.mxu2 %v668_v61  ;;  %v239_v11 = vsub.f32 %v60_v56, %v742_v63 }
  0x2f   :  { %195 = vmatpush.xpose.msra.mxu1 %v194_v7  ;;  %126 = vmatpush.xpose.msra.mxu0 %v665_v60  ;;  %v234_v7 = vand.u32 4294901760, %v745_v1 }
  0x30   :  { %322 = vmatpush.xpose.msra.mxu3 %v665_v60 }
  0x31   :  { %278 = vmatpush.xpose.msra.mxu2 %v680_v3  ;;  %v235_v22 = vsub.f32 %v745_v1, %v234_v7 }
  0x33   :  { %201 = vmatpush.xpose.msra.mxu1 %v200_v26  ;;  %128 = vmatpush.xpose.msra.mxu0 %v672_v0  ;;  %v240_v26 = vand.u32 4294901760, %v239_v11  ;;  %v236_v27 = vand.u32 4294901760, %v235_v22 }
  0x34   :  { %324 = vmatpush.xpose.msra.mxu3 %v672_v0 }
  0x35   :  { %281 = vmatpush.xpose.msra.mxu2 %v693_v17  ;;  %v241_v31 = vsub.f32 %v239_v11, %v240_v26 }
  0x37   :  { %207 = vmatpush.xpose.msra.mxu1 %v206_v37  ;;  %130 = vmatpush.xpose.msra.mxu0 %v685_v6  ;;  %v242_v34 = vand.u32 4294901760, %v241_v31 }
  0x38   :  { %326 = vmatpush.xpose.msra.mxu3 %v685_v6 }
  0x39   :  { %284 = vmatpush.xpose.msra.mxu2 %v699_v23 }
  0x3b   :  { %213 = vmatpush.xpose.msra.mxu1 %v212_v50  ;;  %132 = vmatpush.xpose.msra.mxu0 %v706_v30 }
  0x3c   :  { %328 = vmatpush.xpose.msra.mxu3 %v706_v30 }
  0x3d   :  { %287 = vmatpush.xpose.msra.mxu2 %v719_v43 }
  0x3f   :  { %219 = vmatpush.xpose.msra.mxu1 %v218_v57  ;;  %134 = vmatpush.xpose.msra.mxu0 %v716_v41 }
  0x40   :  { %330 = vmatpush.xpose.msra.mxu3 %v716_v41 }
  0x41   :  { %290 = vmatpush.xpose.msra.mxu2 %v732_v55 }
  0x43   :  { %225 = vmatpush.xpose.msra.mxu1 %v224_v4  ;;  %136 = vmatpush.xpose.msra.mxu0 %v729_v54 }
  0x44   :  { %332 = vmatpush.xpose.msra.mxu3 %v729_v54 }
  0x45   :  { %293 = vmatpush.xpose.msra.mxu2 %v745_v1 }
  0x47   :  { %231 = vmatpush.xpose.msra.mxu1 %v230_v21  ;;  %138 = vmatpush.xpose.msra.mxu0 %v742_v63 }
  0x48   :  { %334 = vmatpush.xpose.msra.mxu3 %v742_v63 }
  0x49   :  { %296 = vmatpush.xpose.msra.mxu2 %v239_v11 }
  0x4b   :  { %345 = vmatpush.xpose.msrb.mxu0 %v150_v18  ;;  %237 = vmatpush.xpose.msra.mxu1 %v236_v27 }
  0x4f   :  { %349 = vmatpush.xpose.msrb.mxu0 %v156_v19  ;;  %243 = vmatpush.xpose.msra.mxu1 %v242_v34 }
  0x53   :  { %412 = vmatpush.xpose.msrb.mxu1 %v567_v8  ;;  %353 = vmatpush.xpose.msrb.mxu0 %v162_v24  ;;  %v139_v8 = vand.u32 4294901760, %v57_v14 }
  0x55   :  { %v140_v18 = vsub.f32 %v57_v14, %v139_v8  ;;  %245 = vmatmul.f32.vlgmr.msra.gmra.mxu1 %v139_v8 }
  0x57   :  { %414 = vmatpush.xpose.msrb.mxu1 %v569_v9  ;;  %357 = vmatpush.xpose.msrb.mxu0 %v168_v32  ;;  %v141_v9 = vand.u32 4294901760, %v140_v18 }
  0x58   :  { %299 = vmatmul.f32.vlgmr.msra.gmra.mxu2 %v140_v18 }
  0x59   :  { %v142_v15 = vsub.f32 %v140_v18, %v141_v9  ;;  %338 = vmatmul.f32.vlgmr.msra.gmra.mxu3 %v141_v9 }
  0x5b   :  { %416 = vmatpush.xpose.msrb.mxu1 %v571_v10  ;;  %361 = vmatpush.xpose.msrb.mxu0 %v174_v38  ;;  %v143_v10 = vand.u32 4294901760, %v142_v15 }
  0x5d   :  { %144 = vmatmul.f32.vlgmr.msra.gmra.mxu0 %v143_v10 }
  0x5f   :  { %418 = vmatpush.xpose.msrb.mxu1 %v574_v12  ;;  %365 = vmatpush.xpose.msrb.mxu0 %v180_v45  ;;  %v539_v12 = vmov 0.0  }
  0x60   :  { %36 = vst [vmem:[#allocation2] sm:$0x1] %v539_v12 }
  0x63   :  { %420 = vmatpush.xpose.msrb.mxu1 %v591_v20  ;;  %369 = vmatpush.xpose.msrb.mxu0 %v186_v49  ;;  %v455_v49 = vstv %s819_s2 }
  0x67   :  { %422 = vmatpush.xpose.msrb.mxu1 %v607_v28  ;;  %373 = vmatpush.xpose.msrb.mxu0 %v192_v59  ;;  %v54_v39 = vld [vmem:[#allocation2] sm:$0x1] }
  0x6b   :  { %424 = vmatpush.xpose.msrb.mxu1 %v620_v35  ;;  %377 = vmatpush.xpose.msrb.mxu0 %v198_v2 }
  0x6f   :  { %426 = vmatpush.xpose.msrb.mxu1 %v641_v46  ;;  %381 = vmatpush.xpose.msrb.mxu0 %v204_v16 }
  0x73   :  { %428 = vmatpush.xpose.msrb.mxu1 %v651_v52  ;;  %385 = vmatpush.xpose.msrb.mxu0 %v210_v29 }
  0x77   :  { %430 = vmatpush.xpose.msrb.mxu1 %v665_v60  ;;  %389 = vmatpush.xpose.msrb.mxu0 %v216_v36 }
  0x7b   :  { %432 = vmatpush.xpose.msrb.mxu1 %v672_v0  ;;  %393 = vmatpush.xpose.msrb.mxu0 %v222_v51 }
  0x7f   :  { %434 = vmatpush.xpose.msrb.mxu1 %v685_v6  ;;  %397 = vmatpush.xpose.msrb.mxu0 %v228_v62 }
  0x83   :  { %436 = vmatpush.xpose.msrb.mxu1 %v706_v30  ;;  %401 = vmatpush.xpose.msrb.mxu0 %v234_v7 }
  0x87   :  { %438 = vmatpush.xpose.msrb.mxu1 %v716_v41  ;;  %405 = vmatpush.xpose.msrb.mxu0 %v240_v26 }
  0x8a   :  { %407 = vmatmul.f32.vlgmr.msrb.gmra.mxu0 %v139_v8 }
  0x8b   :  { %440 = vmatpush.xpose.msrb.mxu1 %v729_v54 }
  0x8f   :  { %442 = vmatpush.xpose.msrb.mxu1 %v742_v63 }
  0x92   :  { %444 = vmatmul.f32.vlgmr.msrb.gmra.mxu1 %v139_v8 }
  0xd2   :  { %v246_v19 = vpop.f32.mrf.mxu1 }
  0xda   :  { %v145_v20 = vpop.f32.mrf.mxu0 }
  0xdb   :  { %v247_v24 = vadd.f32 %v246_v19, %v145_v20  ;;  %v300_v25 = vpop.f32.mrf.mxu2 }
  0xdc   :  { %v339_v32 = vpop.f32.mrf.mxu3 }
  0xdd   :  { %v301_v28 = vadd.f32 %v300_v25, %v247_v24 }
  0xdf   :  { %v340_v33 = vadd.f32 %v339_v32, %v301_v28 }
 0x107   :  { %v408_v35 = vpop.f32.mrf.mxu0 }
 0x108   :  { %v409_v38 = vadd.f32 %v408_v35, %v340_v33 }
 0x10f   :  { %v445_v42 = vpop.f32.mrf.mxu1 }
 0x110   :  { %v446_v45 = vadd.f32 %v445_v42, %v409_v38 }
 0x112   :  { %v448_v46 = vadd.f32 %v446_v45, %v54_v39 }
 0x114   :  { %449 = vst [vmem:[#allocation2] sm:$0x1] %v448_v46 }
 0x11b   :  { %v453_v52 = vld [vmem:[#allocation2] sm:$0x1] }
 0x11c   :  { %v456_v53 = vadd.f32 %v455_v49, %v453_v52 }
 0x11e   :  { %v457_v59 = vmul.f32 1.442695, %v456_v53 }
 0x120   :  { %482 = vpow2.f32 %v457_v59 }
 0x126   :  { %v483_v60 = vpop.eup %482 }
 0x127   :  { %459 = vst [vmem:[#allocation7] sm:$0x1] %v483_v60 }
 0x128   :  { %470 = dma.vmem_to_hbm [thread:$0]  %s466_s22, 16, %s468_s25, [#allocation6]  }
 0x129   :  { %534 = dma.done.wait [#allocation6], 16  }
 0x12a   :  { %535 = vsyncadd [#allocation6], 4294967280 }
 0x12b   :  { %475 = vsyncpa [#allocation5], 1 }
 0x12c   :  { %476 = vsyncpa [#allocation6], 1 }

</bundles_post_ra>
